<compile_context>
chip_gen: v7x
topology: tpu7x:2x2x1
jax: 0.10.0
libtpu: 0.0.40
codegen_flags: <defaults>
</compile_context>

<pallas_src>
import functools

import jax
import jax.numpy as jnp
from jax.experimental import pallas as pl
from jax.experimental.pallas import tpu as pltpu

LANE = 128        # TPU lane width; fc2 output is padded up to a multiple of this.
SUBLANE = 8       # f32 sublane granularity for batch tiles.
TILE_M_MAX = 1024 # batch-tile cap (keeps per-step VMEM bounded on v7x).


def _round_up(n, m):
    return ((n + m - 1) // m) * m


def _mlp_kernel(x_ref, w1_ref, b1_ref, w2_ref, b2_ref, o_ref):
    # Cast x to bf16 in-kernel (free VPU slot); fc1 on the MXU, f32 accumulate.
    x_b = x_ref[...].astype(jnp.bfloat16)
    h = jnp.dot(x_b, w1_ref[...], preferred_element_type=jnp.float32)
    # Bias add + ReLU in f32 on the VPU (v5e has no bf16 VPU path).
    h = jnp.maximum(h + b1_ref[...], 0.0)
    # fc2: cast activations to bf16 only for the MXU, accumulate in f32.
    y = jnp.dot(h.astype(jnp.bfloat16), w2_ref[...],
                preferred_element_type=jnp.float32)
    o_ref[...] = (y + b2_ref[...]).astype(o_ref.dtype)


def prepare_params(w1, b1, w2, b2):
    """One-time weight prep (call once, reuse every forward).

    w1: (input_dim, hidden_dim) f32, b1: (hidden_dim,) f32
    w2: (hidden_dim, output_dim) f32, b2: (output_dim,) f32
    Returns (w1_bf16, b1_2d_f32, w2_padded_bf16, b2_padded_2d_f32).
    """
    input_dim, hidden_dim = w1.shape
    output_dim = w2.shape[1]
    out_pad = max(LANE, _round_up(output_dim, LANE))

    w2_p = jnp.zeros((hidden_dim, out_pad), jnp.float32).at[:, :output_dim].set(w2)
    b2_p = jnp.zeros((1, out_pad), jnp.float32).at[:, :output_dim].set(b2)

    w1_b = w1.astype(jnp.bfloat16)
    w2_b = w2_p.astype(jnp.bfloat16)
    b1_2d = b1.reshape(1, hidden_dim)
    return w1_b, b1_2d, w2_b, b2_p


@functools.partial(jax.jit, static_argnames=("output_dim",))
def simple_planner_forward(x, w1_b, b1_2d, w2_b, b2_p, *, output_dim):
    """Forward pass of SimplePlanner on pre-prepped params.

    x:     (B, input_dim)              float32
    w1_b:  (input_dim, hidden_dim)     bfloat16
    b1_2d: (1, hidden_dim)             float32
    w2_b:  (hidden_dim, out_pad)       bfloat16 (lane-padded fc2 weight)
    b2_p:  (1, out_pad)                float32  (lane-padded fc2 bias)
    Returns (B, output_dim) float32.
    """
    B, input_dim = x.shape
    hidden_dim = w1_b.shape[1]
    out_pad = w2_b.shape[1]

    # Batch tile: multiple of 8 sublanes, capped to bound VMEM per step.
    tile_m = min(TILE_M_MAX, _round_up(B, SUBLANE))
    B_pad = _round_up(B, tile_m)
    if B_pad != B:
        x = jnp.pad(x, ((0, B_pad - B), (0, 0)))
    grid_m = B_pad // tile_m

    flops = 2 * B_pad * (input_dim * hidden_dim + hidden_dim * out_pad)
    bytes_accessed = (B_pad * input_dim * 4 +            # x (f32 in)
                      input_dim * hidden_dim * 2 +       # w1 bf16
                      hidden_dim * 4 +                    # b1 f32
                      hidden_dim * out_pad * 2 +          # w2 bf16
                      out_pad * 4 +                       # b2 f32
                      B_pad * out_pad * 4)                # out f32
    cost = pl.CostEstimate(flops=flops, transcendentals=0,
                           bytes_accessed=bytes_accessed)

    out_padded = pl.pallas_call(
        _mlp_kernel,
        out_shape=jax.ShapeDtypeStruct((B_pad, out_pad), jnp.float32),
        grid=(grid_m,),
        in_specs=[
            # x: tiled over the batch.
            pl.BlockSpec((tile_m, input_dim), lambda i: (i, 0)),
            # Weights / biases: constant index_map -> VMEM-resident across steps.
            pl.BlockSpec((input_dim, hidden_dim), lambda i: (0, 0)),
            pl.BlockSpec((1, hidden_dim), lambda i: (0, 0)),
            pl.BlockSpec((hidden_dim, out_pad), lambda i: (0, 0)),
            pl.BlockSpec((1, out_pad), lambda i: (0, 0)),
        ],
        out_specs=pl.BlockSpec((tile_m, out_pad), lambda i: (i, 0)),
        compiler_params=pltpu.CompilerParams(
            dimension_semantics=("parallel",)),
        cost_estimate=cost,
    )(x, w1_b, b1_2d, w2_b, b2_p)

    # Slice fuses under jit (cheap); padded lanes are exact zeros.
    return out_padded[:B, :output_dim]


def init_params(key, input_dim=128, hidden_dim=256, output_dim=10):
    """Deterministic synthetic init (PyTorch-Linear-like uniform bounds).

    Returns f32 weights already transposed to (in, out) layout.
    """
    k1, k2, k3, k4 = jax.random.split(key, 4)
    bound1 = 1.0 / jnp.sqrt(input_dim)
    bound2 = 1.0 / jnp.sqrt(hidden_dim)
    w1 = jax.random.uniform(k1, (input_dim, hidden_dim), jnp.float32,
                            -bound1, bound1)
    b1 = jax.random.uniform(k2, (hidden_dim,), jnp.float32, -bound1, bound1)
    w2 = jax.random.uniform(k3, (hidden_dim, output_dim), jnp.float32,
                            -bound2, bound2)
    b2 = jax.random.uniform(k4, (output_dim,), jnp.float32, -bound2, bound2)
    return w1, b1, w2, b2


if __name__ == "__main__":
    key = jax.random.PRNGKey(0)
    k_x, k_p = jax.random.split(key)

    B, input_dim, hidden_dim, output_dim = 8, 128, 256, 10
    x = jax.random.normal(k_x, (B, input_dim), jnp.float32)
    w1, b1, w2, b2 = init_params(k_p, input_dim, hidden_dim, output_dim)

    # One-time weight prep (hoisted out of the per-call path).
    params = prepare_params(w1, b1, w2, b2)

    out = simple_planner_forward(x, *params, output_dim=output_dim)
    out = jax.block_until_ready(out)
    assert out.shape == (B, output_dim)

    # Matched-precision reference (same bf16 MXU inputs, f32 accumulation).
    xb, w1b, w2b = (x.astype(jnp.bfloat16), w1.astype(jnp.bfloat16),
                    w2.astype(jnp.bfloat16))
    h_ref = jnp.maximum(
        jnp.dot(xb, w1b, preferred_element_type=jnp.float32) + b1, 0.0)
    ref_bf16 = jnp.dot(h_ref.astype(jnp.bfloat16), w2b,
                       preferred_element_type=jnp.float32) + b2
    assert jnp.allclose(out, ref_bf16, atol=1e-3, rtol=1e-3)

    # Full-f32 PyTorch-equivalent reference (looser tolerance: bf16 matmuls).
    ref_f32 = jnp.maximum(x @ w1 + b1, 0.0) @ w2 + b2
    assert jnp.allclose(out, ref_f32, atol=2e-2, rtol=2e-2)

    print("KERNEL_OK")
</pallas_src>

<mosaic_0001>
module attributes {stable_mosaic.version = 11 : i64} {
  func.func @_mlp_kernel(%arg0: i32, %arg1: memref<8x128xf32, #tpu.memory_space<vmem>>, %arg2: memref<128x256xbf16, #tpu.memory_space<vmem>>, %arg3: memref<1x256xf32, #tpu.memory_space<vmem>>, %arg4: memref<256x128xbf16, #tpu.memory_space<vmem>>, %arg5: memref<1x128xf32, #tpu.memory_space<vmem>>, %arg6: memref<8x128xf32, #tpu.memory_space<vmem>>) attributes {dimension_semantics = [#tpu.dimension_semantics<parallel>], iteration_bounds = array<i64: 1>, scalar_prefetch = 0 : i64, scratch_operands = 0 : i64, tpu.core_type = #tpu.core_type<tc>, window_params = [{transform_indices = @transform_0, window_bounds = array<i64: 8, 128>}, {pipeline_mode = #tpu.pipeline_mode<synchronous>, transform_indices = @transform_1, window_bounds = array<i64: 128, 256>}, {pipeline_mode = #tpu.pipeline_mode<synchronous>, transform_indices = @transform_2, window_bounds = array<i64: 1, 256>}, {pipeline_mode = #tpu.pipeline_mode<synchronous>, transform_indices = @transform_3, window_bounds = array<i64: 256, 128>}, {pipeline_mode = #tpu.pipeline_mode<synchronous>, transform_indices = @transform_4, window_bounds = array<i64: 1, 128>}, {transform_indices = @transform_5, window_bounds = array<i64: 8, 128>}]} {
    %c0 = arith.constant 0 : index
    %c0_0 = arith.constant 0 : index
    %0 = vector.load %arg1[%c0, %c0_0] : memref<8x128xf32, #tpu.memory_space<vmem>>, vector<8x128xf32>
    %1 = arith.truncf %0 : vector<8x128xf32> to vector<8x128xbf16>
    %c0_1 = arith.constant 0 : index
    %c0_2 = arith.constant 0 : index
    %2 = vector.load %arg2[%c0_1, %c0_2] : memref<128x256xbf16, #tpu.memory_space<vmem>>, vector<128x256xbf16>
    %cst = arith.constant dense<0.000000e+00> : vector<8x256xf32>
    %3 = tpu.matmul %1, %2, %cst {dimension_numbers = #tpu.dot_dimension_numbers<[1], [0], [0], [1], [0, 0, 1, 1], [], []>} : vector<8x128xbf16>, vector<128x256xbf16>, vector<8x256xf32> -> vector<8x256xf32>
    %c0_3 = arith.constant 0 : index
    %c0_4 = arith.constant 0 : index
    %4 = vector.load %arg3[%c0_3, %c0_4] : memref<1x256xf32, #tpu.memory_space<vmem>>, vector<1x256xf32>
    %5 = vector.broadcast %4 : vector<1x256xf32> to vector<8x256xf32>
    %6 = arith.addf %3, %5 : vector<8x256xf32>
    %cst_5 = arith.constant 0.000000e+00 : f32
    %7 = vector.broadcast %cst_5 : f32 to vector<8x256xf32>
    %8 = arith.maximumf %6, %7 : vector<8x256xf32>
    %9 = arith.truncf %8 : vector<8x256xf32> to vector<8x256xbf16>
    %c0_6 = arith.constant 0 : index
    %c0_7 = arith.constant 0 : index
    %10 = vector.load %arg4[%c0_6, %c0_7] : memref<256x128xbf16, #tpu.memory_space<vmem>>, vector<256x128xbf16>
    %cst_8 = arith.constant dense<0.000000e+00> : vector<8x128xf32>
    %11 = tpu.matmul %9, %10, %cst_8 {dimension_numbers = #tpu.dot_dimension_numbers<[1], [0], [0], [1], [0, 0, 1, 1], [], []>} : vector<8x256xbf16>, vector<256x128xbf16>, vector<8x128xf32> -> vector<8x128xf32>
    %c0_9 = arith.constant 0 : index
    %c0_10 = arith.constant 0 : index
    %12 = vector.load %arg5[%c0_9, %c0_10] : memref<1x128xf32, #tpu.memory_space<vmem>>, vector<1x128xf32>
    %13 = vector.broadcast %12 : vector<1x128xf32> to vector<8x128xf32>
    %14 = arith.addf %11, %13 : vector<8x128xf32>
    %c0_11 = arith.constant 0 : index
    %c0_12 = arith.constant 0 : index
    %15 = vector.load %arg6[%c0_11, %c0_12] : memref<8x128xf32, #tpu.memory_space<vmem>>, vector<8x128xf32>
    tpu.vector_store %arg6[%c0_11, %c0_12], %14 {strides = array<i32>} : memref<8x128xf32, #tpu.memory_space<vmem>>, vector<8x128xf32>,
    return
  }
  func.func @transform_0(%arg0: i32) -> (i32, i32) {
    %c0_i32 = arith.constant 0 : i32
    %c0_i32_0 = arith.constant 0 : i32
    return %arg0, %c0_i32 : i32, i32
  }
  func.func @transform_1(%arg0: i32) -> (i32, i32) {
    %c0_i32 = arith.constant 0 : i32
    %c0_i32_0 = arith.constant 0 : i32
    %c0_i32_1 = arith.constant 0 : i32
    return %c0_i32, %c0_i32_0 : i32, i32
  }
  func.func @transform_2(%arg0: i32) -> (i32, i32) {
    %c0_i32 = arith.constant 0 : i32
    %c0_i32_0 = arith.constant 0 : i32
    %c0_i32_1 = arith.constant 0 : i32
    return %c0_i32, %c0_i32_0 : i32, i32
  }
  func.func @transform_3(%arg0: i32) -> (i32, i32) {
    %c0_i32 = arith.constant 0 : i32
    %c0_i32_0 = arith.constant 0 : i32
    %c0_i32_1 = arith.constant 0 : i32
    return %c0_i32, %c0_i32_0 : i32, i32
  }
  func.func @transform_4(%arg0: i32) -> (i32, i32) {
    %c0_i32 = arith.constant 0 : i32
    %c0_i32_0 = arith.constant 0 : i32
    %c0_i32_1 = arith.constant 0 : i32
    return %c0_i32, %c0_i32_0 : i32, i32
  }
  func.func @transform_5(%arg0: i32) -> (i32, i32) {
    %c0_i32 = arith.constant 0 : i32
    %c0_i32_0 = arith.constant 0 : i32
    return %arg0, %c0_i32 : i32, i32
  }
}

</mosaic_0001>

<bundles_post_ra>
// kernel: simple_planner_forward.1
= control target key start
LH: loop header
LB: loop body
LE: loop exit
PB: predicated region body
PF: predicated region fallthrough
CT: control target
= control target key end

     0   :  { %10 = vsyncpa [#allocation3], 0  ;;  %s699_s0 = inlined_call_operand.hbm [shape: f32[8,128], index: 0, kind: input, shape index: {}]   ;;  %s700_s1 = inlined_call_operand.hbm [shape: bf16[128,256], index: 1, kind: input, shape index: {}]   ;;  %s701_s2 = inlined_call_operand.vmem [shape: f32[1,256], index: 2, kind: input, shape index: {}]   ;;  %s702_s3 = inlined_call_operand.hbm [shape: bf16[256,128], index: 3, kind: input, shape index: {}]   ;;  %s703_s4 = inlined_call_operand.vmem [shape: f32[1,128], index: 4, kind: input, shape index: {}]   ;;  %s704_s5 = inlined_call_operand.hbm [shape: f32[8,128], index: 5, kind: output, shape index: {}]  }
   0x1   :  { %11 = vsyncpa [#allocation6], 0 }
   0x2   :  { %12 = vsyncpa [#allocation4], 0  ;;  %s606_s18 = smov [#allocation5]   ;;  %s512_s22 = scalar_lea.hbm %s700_s1, 2048 }
   0x3   :  { %s28_s19 = sshll.u32 %s606_s18, 4  ;;  %p513_p0 = scmp.ne.s32.totalorder %s700_s1, %s512_s22  ;;  %s29_s19 = int_to_ptr.vmem [resolvable:$true] %s28_s19 }
   0x4   :  { %p516_p1 = scmp.lt.u32.totalorder %s512_s22, %s700_s1 }
   0x6   :  { %p518_p2 = pnand %p516_p1, %p513_p0 }
   0x8   :  { %521 = shalt.err (!%p518_p2)
}
   0x9   :  { %s522_s27 = scalar_lea.vmem %s29_s19, 2048  ;;  %p527_p4 = scmp.lt.s32.totalorder %s29_s19, %s29_s19 }
   0xa   :  { %p523_p3 = scmp.ne.s32.totalorder %s29_s19, %s522_s27  ;;  %p528_p5 = scmp.lt.s32.totalorder %s522_s27, %s522_s27 }
   0xc   :  { %p529_p6 = por %p528_p5, %p527_p4 }
   0xe   :  { %p530_p7 = pnand %p529_p6, %p523_p3 }
  0x10   :  { %533 = shalt.err (!%p530_p7)
}
  0x11   :  { %s607_s28 = smov 128   ;;  %s608_s29 = smov 8  }
  0x12   :  { %34 = dma.hbm_to_vmem [thread:$0]  %s700_s1, 2048, %s29_s19, [#allocation6], %s607_s28, %s607_s28, %s608_s29  }
  0x13   :  { %s609_s7 = smov [#allocation2]   ;;  %s610_s9 = smov [#allocation7]  }
  0x14   :  { %s19_s8 = sshll.u32 %s609_s7, 4  ;;  %s42_s10 = sshll.u32 %s610_s9, 4  ;;  %s20_s8 = int_to_ptr.vmem [resolvable:$true] %s19_s8  ;;  %s43_s10 = int_to_ptr.vmem [resolvable:$true] %s42_s10 }
  0x15   :  { %s534_s13 = scalar_lea.hbm %s699_s0, 128 }
  0x16   :  { %p535_p8 = scmp.ne.s32.totalorder %s699_s0, %s534_s13  ;;  %p538_p9 = scmp.lt.u32.totalorder %s534_s13, %s699_s0 }
  0x18   :  { %p540_p10 = pnand %p538_p9, %p535_p8 }
  0x1a   :  { %543 = shalt.err (!%p540_p10)
}
  0x1b   :  { %s544_s1 = scalar_lea.vmem %s20_s8, 128  ;;  %p549_p12 = scmp.lt.s32.totalorder %s20_s8, %s20_s8 }
  0x1c   :  { %p545_p11 = scmp.ne.s32.totalorder %s20_s8, %s544_s1  ;;  %p550_p13 = scmp.lt.s32.totalorder %s544_s1, %s544_s1 }
  0x1e   :  { %p551_p0 = por %p550_p13, %p549_p12 }
  0x20   :  { %p552_p1 = pnand %p551_p0, %p545_p11 }
  0x22   :  { %555 = shalt.err (!%p552_p1)
}
  0x23   :  { %22 = dma.hbm_to_vmem [thread:$0]  %s699_s0, 128, %s20_s8, [#allocation3]  }
  0x24   :  { %s556_s22 = scalar_lea.hbm %s702_s3, 2048 }
  0x25   :  { %p557_p2 = scmp.ne.s32.totalorder %s702_s3, %s556_s22  ;;  %p560_p3 = scmp.lt.u32.totalorder %s556_s22, %s702_s3 }
  0x27   :  { %p562_p4 = pnand %p560_p3, %p557_p2 }
  0x29   :  { %565 = shalt.err (!%p562_p4)
}
  0x2a   :  { %s566_s27 = scalar_lea.vmem %s43_s10, 2048  ;;  %p571_p6 = scmp.lt.s32.totalorder %s43_s10, %s43_s10 }
  0x2b   :  { %p567_p5 = scmp.ne.s32.totalorder %s43_s10, %s566_s27  ;;  %p572_p7 = scmp.lt.s32.totalorder %s566_s27, %s566_s27 }
  0x2d   :  { %p573_p8 = por %p572_p7, %p571_p6 }
  0x2f   :  { %p574_p9 = pnand %p573_p8, %p567_p5 }
  0x31   :  { %577 = shalt.err (!%p574_p9)
}
  0x32   :  { %s611_s0 = smov 64   ;;  %s612_s28 = smov 4  }
  0x33   :  { %48 = dma.hbm_to_vmem [thread:$0]  %s702_s3, 2048, %s43_s10, [#allocation6], %s611_s0, %s611_s0, %s612_s28  }
  0x34   :  { %600 = dma.done.wait [#allocation3], 128  }
  0x35   :  { %601 = vsyncadd [#allocation3], 4294967168 }
  0x36   :  { %602 = dma.done.wait [#allocation6], 4096  }
  0x37   :  { %603 = vsyncadd [#allocation6], 4294963200  ;;  %v613_v0 = vmov 0   ;;  %v472_v1 = vld [vmem:[#allocation5 + $0x4] ss:$8 sps:$4 sm:$0xff]   ;;  %v500_v15 = vld [vmem:[#allocation7 + $0x50] sm:$0xff]   ;;  %v81_v35 = vlaneseq }
  0x38   :  { %203 = vmatprep.mubr.bf16.mxu0 %v613_v0  ;;  %v474_v2 = vld [vmem:[#allocation5] ss:$8 sps:$4 sm:$0xff]   ;;  %171 = vmatprep.subr.bf16.mxu0 %v472_v1  ;;  %v475_v3 = vld [vmem:[#allocation5 + $0x14] ss:$8 sps:$4 sm:$0xff]   ;;  %v477_v4 = vld [vmem:[#allocation5 + $0x10] ss:$8 sps:$4 sm:$0xff]  }
  0x39   :  { %172 = vmatpush1.bf16.msra.mxu0 %v474_v2  ;;  %v478_v5 = vld [vmem:[#allocation5 + $0x24] ss:$8 sps:$4 sm:$0xff]   ;;  %v480_v6 = vld [vmem:[#allocation5 + $0x20] ss:$8 sps:$4 sm:$0xff]   ;;  %v481_v7 = vld [vmem:[#allocation5 + $0x34] ss:$8 sps:$4 sm:$0xff]  }
  0x3a   :  { %173 = vmatprep.subr.bf16.mxu0 %v475_v3  ;;  %v483_v8 = vld [vmem:[#allocation5 + $0x30] ss:$8 sps:$4 sm:$0xff]   ;;  %v484_v9 = vld [vmem:[#allocation5 + $0x44] ss:$8 sps:$4 sm:$0xff]   ;;  %v486_v12 = vld [vmem:[#allocation5 + $0x40] ss:$8 sps:$4 sm:$0xff]  }
  0x3b   :  { %v496_v10 = vld [vmem:[#allocation7 + $0x40] sm:$0xff]   ;;  %v498_v13 = vld [vmem:[#allocation7 + $0x48] sm:$0xff]   ;;  %v487_v16 = vld [vmem:[#allocation5 + $0x54] ss:$8 sps:$4 sm:$0xff]   ;;  %v82_v36 = vshrl.u32 %v81_v35, 7 }
  0x3c   :  { %v497_v11 = vld [vmem:[#allocation7] sm:$0xff]   ;;  %441 = vmatprep.subr.bf16.mxu1 %v496_v10  ;;  %v499_v14 = vld [vmem:[#allocation7 + $0x8] sm:$0xff]   ;;  %v489_v17 = vld [vmem:[#allocation5 + $0x50] ss:$8 sps:$4 sm:$0xff]  }
  0x3d   :  { %174 = vmatpush1.bf16.msra.mxu0 %v477_v4  ;;  %442 = vmatpush3.bf16.msra.mxu1 %v497_v11  ;;  %v501_v18 = vld [vmem:[#allocation7 + $0x10] sm:$0xff]   ;;  %v502_v19 = vld [vmem:[#allocation7 + $0x58] sm:$0xff]   ;;  %v490_v20 = vld [vmem:[#allocation5 + $0x64] ss:$8 sps:$4 sm:$0xff]   ;;  %v83_v37 = vsub.s32 0, %v82_v36  ;;  %v87_v39 = vsub.s32 1, %v82_v36 }
  0x3e   :  { %175 = vmatprep.subr.bf16.mxu0 %v478_v5  ;;  %443 = vmatprep.subr.bf16.mxu1 %v498_v13  ;;  %v492_v21 = vld [vmem:[#allocation5 + $0x60] ss:$8 sps:$4 sm:$0xff]   ;;  %v493_v22 = vld [vmem:[#allocation5 + $0x74] ss:$8 sps:$4 sm:$0xff]   ;;  %v495_v26 = vld [vmem:[#allocation5 + $0x70] ss:$8 sps:$4 sm:$0xff]  }
  0x3f   :  { %v503_v23 = vld [vmem:[#allocation7 + $0x18] sm:$0xff]   ;;  %v504_v24 = vld [vmem:[#allocation7 + $0x60] sm:$0xff]   ;;  %v506_v28 = vld [vmem:[#allocation7 + $0x68] sm:$0xff]  }
  0x40   :  { %v505_v25 = vld [vmem:[#allocation7 + $0x20] sm:$0xff]   ;;  %v61_v27 = vld [vmem:[#allocation2] sm:$0xff]  ;;  %v507_v30 = vld [vmem:[#allocation7 + $0x28] sm:$0xff]  }
  0x41   :  { %176 = vmatpush1.bf16.msra.mxu0 %v480_v6  ;;  %444 = vmatpush3.bf16.msra.mxu1 %v499_v14  ;;  %v62_v29 = vpack.c.bf16 %v61_v27, %v61_v27  ;;  %v508_v31 = vld [vmem:[#allocation7 + $0x70] sm:$0xff]   ;;  %v510_v33 = vld [vmem:[#allocation7 + $0x78] sm:$0xff]  }
  0x42   :  { %177 = vmatprep.subr.bf16.mxu0 %v481_v7  ;;  %445 = vmatprep.subr.bf16.mxu1 %v500_v15  ;;  %v509_v32 = vld [vmem:[#allocation7 + $0x30] sm:$0xff]   ;;  %v511_v34 = vld [vmem:[#allocation7 + $0x38] sm:$0xff]  }
  0x43   :  { %v79_v38 = vld [vmem:[%s701_s2] sm:$0x3]  ;;  %s614_s2 = smov [#allocation8]  }
  0x44   :  { %v84_v40 = vrot.slane %v79_v38, %v83_v37  ;;  %v88_v41 = vrot.slane %v79_v38, %v87_v39  ;;  %v424_v53 = vld [vmem:[%s703_s4] ss:$0 sm:$0xff]  ;;  %s398_s9 = sshll.u32 %s614_s2, 4  ;;  %s399_s9 = int_to_ptr.vmem [resolvable:$true] %s398_s9 }
  0x45   :  { %178 = vmatpush1.bf16.msra.mxu0 %v483_v8  ;;  %446 = vmatpush3.bf16.msra.mxu1 %v501_v18  ;;  %s578_s10 = scalar_lea.vmem %s399_s9, 128  ;;  %p583_p11 = scmp.lt.s32.totalorder %s399_s9, %s399_s9 }
  0x46   :  { %179 = vmatprep.subr.bf16.mxu0 %v484_v9  ;;  %447 = vmatprep.subr.bf16.mxu1 %v502_v19  ;;  %p579_p10 = scmp.ne.s32.totalorder %s399_s9, %s578_s10  ;;  %p584_p12 = scmp.lt.s32.totalorder %s578_s10, %s578_s10 }
  0x48   :  { %p585_p13 = por %p584_p12, %p583_p11 }
  0x49   :  { %180 = vmatpush1.bf16.msra.mxu0 %v486_v12  ;;  %448 = vmatpush3.bf16.msra.mxu1 %v503_v23 }
  0x4a   :  { %181 = vmatprep.subr.bf16.mxu0 %v487_v16  ;;  %449 = vmatprep.subr.bf16.mxu1 %v504_v24  ;;  %p586_p0 = pnand %p585_p13, %p579_p10 }
  0x4d   :  { %182 = vmatpush1.bf16.msra.mxu0 %v489_v17  ;;  %450 = vmatpush3.bf16.msra.mxu1 %v505_v25 }
  0x4e   :  { %183 = vmatprep.subr.bf16.mxu0 %v490_v20  ;;  %451 = vmatprep.subr.bf16.mxu1 %v506_v28 }
  0x51   :  { %184 = vmatpush1.bf16.msra.mxu0 %v492_v21  ;;  %452 = vmatpush3.bf16.msra.mxu1 %v507_v30 }
  0x52   :  { %185 = vmatprep.subr.bf16.mxu0 %v493_v22  ;;  %453 = vmatprep.subr.bf16.mxu1 %v508_v31 }
  0x55   :  { %186 = vmatpush1.bf16.msra.mxu0 %v495_v26  ;;  %454 = vmatpush3.bf16.msra.mxu1 %v509_v32 }
  0x56   :  { %455 = vmatprep.subr.bf16.mxu1 %v510_v33 }
  0x58   :  { %204 = vmatmul.mubr.bf16.vlgmr.msra.gmra.mrb[0].mxu0 %v62_v29 }
  0x59   :  { %456 = vmatpush3.bf16.msra.mxu1 %v511_v34 }
 0x12b   :  { %v205_v42 = vpop.f32.mrb[0].mxu0 }
 0x12c   :  { %v206_v43 = vadd.f32 %v205_v42, %v84_v40  ;;  %v207_v44 = vpop.f32.mrb[1].mxu0 }
 0x12d   :  { %v208_v45 = vadd.f32 %v207_v44, %v88_v41  ;;  %v209_v46 = vpop.f32.mrb[2].mxu0 }
 0x12e   :  { %v212_v47 = vmax.f32 %v206_v43, 0.0  ;;  %v210_v48 = vpop.f32.mrb[3].mxu0 }
 0x12f   :  { %v213_v49 = vmax.f32 %v208_v45, 0.0 }
 0x130   :  { %v214_v51 = vpack.c.bf16 %v212_v47, %v212_v47 }
 0x131   :  { %v215_v50 = vpack.c.bf16 %v213_v49, %v213_v49 }
 0x133   :  { %383 = vmatprep.mubr.bf16.mxu1 %v215_v50 }
 0x134   :  { %384 = vmatmul.mubr.bf16.vlgmr.msra.gmra.mrb[0].mxu1 %v214_v51 }
 0x207   :  { %v457_v52 = vpop.f32.mrb[0].mxu1 }
 0x208   :  { %v458_v54 = vpop.f32.mrb[1].mxu1 }
 0x209   :  { %v459_v55 = vadd.f32 %v458_v54, %v457_v52  ;;  %v460_v56 = vpop.f32.mrb[2].mxu1 }
 0x20a   :  { %v461_v57 = vpop.f32.mrb[3].mxu1 }
 0x20b   :  { %v386_v58 = vadd.f32 %v459_v55, %v424_v53 }
 0x20d   :  { %391 = vst [vmem:[#allocation8] sm:$0xff] %v386_v58 }
 0x20e   :  { %589 = shalt.err (!%p586_p0)
}
 0x20f   :  { %s590_s4 = scalar_lea.hbm %s704_s5, 128 }
 0x210   :  { %p591_p1 = scmp.ne.s32.totalorder %s704_s5, %s590_s4  ;;  %p594_p2 = scmp.lt.u32.totalorder %s590_s4, %s704_s5 }
 0x212   :  { %p596_p3 = pnand %p594_p2, %p591_p1 }
 0x214   :  { %599 = shalt.err (!%p596_p3)
}
 0x215   :  { %401 = dma.vmem_to_hbm [thread:$0]  %s399_s9, 128, %s704_s5, [#allocation4]  }
 0x216   :  { %604 = dma.done.wait [#allocation4], 128  }
 0x217   :  { %605 = vsyncadd [#allocation4], 4294967168 }
 0x218   :  { %405 = vsyncpa [#allocation3], 1 }
 0x219   :  { %406 = vsyncpa [#allocation6], 1 }
 0x21a   :  { %407 = vsyncpa [#allocation4], 1 }

</bundles_post_ra>
